<compile_context>
chip_gen: v7x
topology: tpu7x:2x2x1
jax: 0.10.0
libtpu: 0.0.40
codegen_flags: <defaults>
</compile_context>

<pallas_src>
import math
from functools import partial

import jax
import jax.numpy as jnp
from jax import lax
from jax.experimental import pallas as pl
from jax.experimental.pallas import tpu as pltpu


# ----------------------- Kernel 1: bias linear (x @ W + b) ---------------------
def _linear_kernel(x_ref, w_ref, b_ref, o_ref):
    o_ref[...] = (
        jnp.dot(x_ref[...], w_ref[...], preferred_element_type=jnp.float32)
        + b_ref[...]
    )


def linear_pallas(x2d, w, b, *, tm=256):
    """(M, K) @ (K, N) + b, tiled over rows; grid axis marked parallel."""
    M, K = x2d.shape
    Kw, N = w.shape
    assert K == Kw
    tm = min(tm, M)
    Mp = pl.cdiv(M, tm) * tm
    if Mp != M:
        x2d = jnp.pad(x2d, ((0, Mp - M), (0, 0)))
    out = pl.pallas_call(
        _linear_kernel,
        out_shape=jax.ShapeDtypeStruct((Mp, N), jnp.float32),
        grid=(Mp // tm,),
        in_specs=[
            pl.BlockSpec((tm, K), lambda i: (i, 0)),
            pl.BlockSpec((K, N), lambda i: (0, 0)),
            pl.BlockSpec((1, N), lambda i: (0, 0)),
        ],
        out_specs=pl.BlockSpec((tm, N), lambda i: (i, 0)),
        compiler_params=pltpu.CompilerParams(dimension_semantics=("parallel",)),
    )(x2d, w, b)
    return out[:M] if Mp != M else out


# --------------- Kernel 2: fused LayerNorm + linear (sr_ratio > 1 kv) ----------
def _ln_linear_kernel(x_ref, g_ref, bt_ref, w_ref, b_ref, o_ref, *, eps):
    x = x_ref[...]
    mu = jnp.mean(x, axis=-1, keepdims=True)
    var = jnp.mean(jnp.square(x - mu), axis=-1, keepdims=True)  # biased (PyTorch LN)
    xn = (x - mu) * lax.rsqrt(var + eps) * g_ref[...] + bt_ref[...]
    o_ref[...] = (
        jnp.dot(xn, w_ref[...], preferred_element_type=jnp.float32) + b_ref[...]
    )


def ln_linear_pallas(x2d, gamma, beta, w, b, *, eps=1e-5, tm=256):
    M, K = x2d.shape
    _, N = w.shape
    tm = min(tm, M)
    Mp = pl.cdiv(M, tm) * tm
    if Mp != M:
        x2d = jnp.pad(x2d, ((0, Mp - M), (0, 0)))
    out = pl.pallas_call(
        partial(_ln_linear_kernel, eps=eps),
        out_shape=jax.ShapeDtypeStruct((Mp, N), jnp.float32),
        grid=(Mp // tm,),
        in_specs=[
            pl.BlockSpec((tm, K), lambda i: (i, 0)),
            pl.BlockSpec((1, K), lambda i: (0, 0)),
            pl.BlockSpec((1, K), lambda i: (0, 0)),
            pl.BlockSpec((K, N), lambda i: (0, 0)),
            pl.BlockSpec((1, N), lambda i: (0, 0)),
        ],
        out_specs=pl.BlockSpec((tm, N), lambda i: (i, 0)),
        compiler_params=pltpu.CompilerParams(dimension_semantics=("parallel",)),
    )(x2d, gamma, beta, w, b)
    return out[:M] if Mp != M else out


# ------------- Kernel 3: softmax attention per (batch*head, q-tile) ------------
def _attn_kernel(q_ref, k_ref, v_ref, o_ref, *, scale):
    q = q_ref[0]  # (TQ, d)
    k = k_ref[0]  # (Nk, d)
    v = v_ref[0]  # (Nk, d)
    # scores = q @ k^T (contract over head_dim) on the MXU; (TQ, Nk) lane-dense
    s = lax.dot_general(
        q, k, (((1,), (1,)), ((), ())), preferred_element_type=jnp.float32
    ) * scale
    m = jnp.max(s, axis=-1, keepdims=True)
    p = jnp.exp(s - m)
    denom = jnp.sum(p, axis=-1, keepdims=True)
    attn = p * pl.reciprocal(denom, approx=False)
    o_ref[0] = jnp.dot(attn, v, preferred_element_type=jnp.float32)


def attention_core_pallas(q4, k4, v4, scale, *, tq=128):
    """q4: (B*heads, N, d); k4/v4: (B*heads, Nk, d) -> (B*heads, N, d)."""
    BH, N, d = q4.shape
    _, Nk, _ = k4.shape
    tq = min(tq, N)
    Np = pl.cdiv(N, tq) * tq
    if Np != N:
        q4 = jnp.pad(q4, ((0, 0), (0, Np - N), (0, 0)))
    out = pl.pallas_call(
        partial(_attn_kernel, scale=scale),
        out_shape=jax.ShapeDtypeStruct((BH, Np, d), jnp.float32),
        grid=(BH, Np // tq),
        in_specs=[
            pl.BlockSpec((1, tq, d), lambda b, t: (b, t, 0)),
            pl.BlockSpec((1, Nk, d), lambda b, t: (b, 0, 0)),
            pl.BlockSpec((1, Nk, d), lambda b, t: (b, 0, 0)),
        ],
        out_specs=pl.BlockSpec((1, tq, d), lambda b, t: (b, t, 0)),
        compiler_params=pltpu.CompilerParams(
            dimension_semantics=("parallel", "parallel")
        ),
    )(q4, k4, v4)
    return out[:, :N] if Np != N else out


# --------------------------------- Full forward --------------------------------
def attention_forward(x, H, W, params, *, num_heads, sr_ratio=1):
    B, N, C = x.shape
    assert C % num_heads == 0 and N == H * W
    d = C // num_heads
    scale = d ** (-0.5)          # qk_scale=None -> head_dim ** -0.5
    x2 = x.reshape(B * N, C)

    if sr_ratio > 1:
        q2 = linear_pallas(x2, params["wq"], params["bq"])
        # Conv2d(C, C, k=sr, s=sr) == non-overlapping patchify + one MXU matmul.
        Hs, Ws = H // sr_ratio, W // sr_ratio
        xp = x.reshape(B, Hs, sr_ratio, Ws, sr_ratio, C)
        xp = jnp.transpose(xp, (0, 1, 3, 5, 2, 4)).reshape(
            B * Hs * Ws, C * sr_ratio * sr_ratio
        )
        xsr = linear_pallas(xp, params["w_sr"], params["b_sr"])
        # LayerNorm fused with the kv projection.
        kv2 = ln_linear_pallas(
            xsr, params["ln_g"], params["ln_b"], params["wkv"], params["bkv"]
        )
        Nk = Hs * Ws
    else:
        # Fused q + kv projection: x read from HBM once, one MXU matmul of width 3C.
        w_qkv = jnp.concatenate([params["wq"], params["wkv"]], axis=1)
        b_qkv = jnp.concatenate([params["bq"], params["bkv"]], axis=1)
        qkv2 = linear_pallas(x2, w_qkv, b_qkv)
        q2, kv2 = qkv2[:, :C], qkv2[:, C:]
        Nk = N

    # Head split / merge (matches the PyTorch reshape/permute) = layout plumbing,
    # left to XLA so kernel blocks keep full head_dim on the lane axis.
    q4 = (
        q2.reshape(B, N, num_heads, d).transpose(0, 2, 1, 3).reshape(B * num_heads, N, d)
    )
    kv = kv2.reshape(B, Nk, 2, num_heads, d).transpose(2, 0, 3, 1, 4)
    k4 = kv[0].reshape(B * num_heads, Nk, d)
    v4 = kv[1].reshape(B * num_heads, Nk, d)

    o4 = attention_core_pallas(q4, k4, v4, scale)
    o2 = o4.reshape(B, num_heads, N, d).transpose(0, 2, 1, 3).reshape(B * N, C)
    y = linear_pallas(o2, params["w_proj"], params["b_proj"])
    # attn_drop / proj_drop: p = 0.0 -> identity.
    return y.reshape(B, N, C)


# ------------------------------ deterministic params ---------------------------
def init_params(key, C, sr_ratio):
    ks = jax.random.split(key, 4)
    std = 0.02
    tn = lambda k, s: std * jax.random.truncated_normal(k, -2.0, 2.0, s, jnp.float32)
    p = dict(
        wq=tn(ks[0], (C, C)),                      # stored as (in, out)
        bq=jnp.zeros((1, C), jnp.float32),         # qkv_bias=False
        wkv=tn(ks[1], (C, 2 * C)),
        bkv=jnp.zeros((1, 2 * C), jnp.float32),    # qkv_bias=False
        w_proj=tn(ks[2], (C, C)),
        b_proj=jnp.zeros((1, C), jnp.float32),     # init.constant_(bias, 0)
    )
    if sr_ratio > 1:
        fan_out = sr_ratio * sr_ratio * C
        w_conv = jax.random.normal(
            ks[3], (C, C, sr_ratio, sr_ratio), jnp.float32
        ) * math.sqrt(2.0 / fan_out)
        p["w_sr_conv"] = w_conv                                        # (O, I, kh, kw)
        p["w_sr"] = w_conv.reshape(C, C * sr_ratio * sr_ratio).T       # (I*kh*kw, O)
        p["b_sr"] = jnp.zeros((1, C), jnp.float32)
        p["ln_g"] = jnp.ones((1, C), jnp.float32)
        p["ln_b"] = jnp.zeros((1, C), jnp.float32)
    return p


# ---------------------------- pure-JAX reference (check) -----------------------
def reference_forward(x, H, W, params, *, num_heads, sr_ratio=1, eps=1e-5):
    B, N, C = x.shape
    d = C // num_heads
    scale = d ** (-0.5)
    pe = lax.Precision.HIGHEST
    q = jnp.einsum("bnc,co->bno", x, params["wq"], precision=pe) + params["bq"][0]
    q = q.reshape(B, N, num_heads, d).transpose(0, 2, 1, 3)
    if sr_ratio > 1:
        x_ = x.transpose(0, 2, 1).reshape(B, C, H, W)
        x_ = lax.conv_general_dilated(
            x_, params["w_sr_conv"], window_strides=(sr_ratio, sr_ratio),
            padding="VALID", dimension_numbers=("NCHW", "OIHW", "NCHW"),
            precision=pe,
        ) + params["b_sr"][0][None, :, None, None]
        Nk = (H // sr_ratio) * (W // sr_ratio)
        x_ = x_.reshape(B, C, Nk).transpose(0, 2, 1)
        mu = jnp.mean(x_, axis=-1, keepdims=True)
        var = jnp.mean(jnp.square(x_ - mu), axis=-1, keepdims=True)
        kv_src = (x_ - mu) * lax.rsqrt(var + eps) * params["ln_g"][0] + params["ln_b"][0]
    else:
        kv_src, Nk = x, N
    kv = jnp.einsum("bnc,co->bno", kv_src, params["wkv"], precision=pe) + params["bkv"][0]
    kv = kv.reshape(B, Nk, 2, num_heads, d).transpose(2, 0, 3, 1, 4)
    k, v = kv[0], kv[1]
    attn = jnp.einsum("bhqd,bhkd->bhqk", q, k, precision=pe) * scale
    attn = jax.nn.softmax(attn, axis=-1)
    o = jnp.einsum("bhqk,bhkd->bhqd", attn, v, precision=pe)
    o = o.transpose(0, 2, 1, 3).reshape(B, N, C)
    return jnp.einsum("bnc,co->bno", o, params["w_proj"], precision=pe) + params["b_proj"][0]


if __name__ == "__main__":
    B, H, W, C, heads = 2, 8, 8, 32, 8
    N = H * W
    key = jax.random.PRNGKey(0)
    kx, kp1, kp2 = jax.random.split(key, 3)
    x = jax.random.normal(kx, (B, N, C), jnp.float32)

    # Path 1: sr_ratio = 1 (plain multi-head attention)
    p1 = init_params(kp1, C, sr_ratio=1)
    fwd1 = jax.jit(lambda xx, pp: attention_forward(xx, H, W, pp, num_heads=heads, sr_ratio=1))
    out1 = jax.block_until_ready(fwd1(x, p1))

    # Path 2: sr_ratio = 2 (spatial reduction: conv k=s=2 + LayerNorm on kv source)
    p2 = init_params(kp2, C, sr_ratio=2)
    fwd2 = jax.jit(lambda xx, pp: attention_forward(xx, H, W, pp, num_heads=heads, sr_ratio=2))
    out2 = jax.block_until_ready(fwd2(x, p2))

    ref1 = reference_forward(x, H, W, p1, num_heads=heads, sr_ratio=1)
    ref2 = reference_forward(x, H, W, p2, num_heads=heads, sr_ratio=2)

    assert out1.shape == (B, N, C) and out2.shape == (B, N, C)
    assert bool(jnp.all(jnp.isfinite(out1))) and bool(jnp.all(jnp.isfinite(out2)))
    err1 = float(jnp.max(jnp.abs(out1 - ref1)))
    err2 = float(jnp.max(jnp.abs(out2 - ref2)))
    assert err1 < 5e-4, f"sr=1 mismatch vs reference: {err1}"
    assert err2 < 5e-4, f"sr=2 mismatch vs reference: {err2}"
    print("KERNEL_OK")
</pallas_src>

<mosaic_0001>
module attributes {stable_mosaic.version = 11 : i64} {
  func.func @_linear_kernel(%arg0: i32, %arg1: memref<128x32xf32, #tpu.memory_space<vmem>>, %arg2: memref<32x96xf32, #tpu.memory_space<vmem>>, %arg3: memref<1x96xf32, #tpu.memory_space<vmem>>, %arg4: memref<128x96xf32, #tpu.memory_space<vmem>>) attributes {dimension_semantics = [#tpu.dimension_semantics<parallel>], iteration_bounds = array<i64: 1>, scalar_prefetch = 0 : i64, scratch_operands = 0 : i64, tpu.core_type = #tpu.core_type<tc>, window_params = [{transform_indices = @transform_0, window_bounds = array<i64: 128, 32>}, {pipeline_mode = #tpu.pipeline_mode<synchronous>, transform_indices = @transform_1, window_bounds = array<i64: 32, 96>}, {pipeline_mode = #tpu.pipeline_mode<synchronous>, transform_indices = @transform_2, window_bounds = array<i64: 1, 96>}, {transform_indices = @transform_3, window_bounds = array<i64: 128, 96>}]} {
    %c0 = arith.constant 0 : index
    %c0_0 = arith.constant 0 : index
    %0 = vector.load %arg1[%c0, %c0_0] : memref<128x32xf32, #tpu.memory_space<vmem>>, vector<128x32xf32>
    %c0_1 = arith.constant 0 : index
    %c0_2 = arith.constant 0 : index
    %1 = vector.load %arg2[%c0_1, %c0_2] : memref<32x96xf32, #tpu.memory_space<vmem>>, vector<32x96xf32>
    %cst = arith.constant dense<0.000000e+00> : vector<128x96xf32>
    %2 = tpu.matmul %0, %1, %cst {dimension_numbers = #tpu.dot_dimension_numbers<[1], [0], [0], [1], [0, 0, 1, 1], [], []>} : vector<128x32xf32>, vector<32x96xf32>, vector<128x96xf32> -> vector<128x96xf32>
    %c0_3 = arith.constant 0 : index
    %c0_4 = arith.constant 0 : index
    %3 = vector.load %arg3[%c0_3, %c0_4] : memref<1x96xf32, #tpu.memory_space<vmem>>, vector<1x96xf32>
    %4 = vector.broadcast %3 : vector<1x96xf32> to vector<128x96xf32>
    %5 = arith.addf %2, %4 : vector<128x96xf32>
    %c0_5 = arith.constant 0 : index
    %c0_6 = arith.constant 0 : index
    %6 = vector.load %arg4[%c0_5, %c0_6] : memref<128x96xf32, #tpu.memory_space<vmem>>, vector<128x96xf32>
    tpu.vector_store %arg4[%c0_5, %c0_6], %5 {strides = array<i32>} : memref<128x96xf32, #tpu.memory_space<vmem>>, vector<128x96xf32>,
    return
  }
  func.func @transform_0(%arg0: i32) -> (i32, i32) {
    %c0_i32 = arith.constant 0 : i32
    %c0_i32_0 = arith.constant 0 : i32
    return %arg0, %c0_i32 : i32, i32
  }
  func.func @transform_1(%arg0: i32) -> (i32, i32) {
    %c0_i32 = arith.constant 0 : i32
    %c0_i32_0 = arith.constant 0 : i32
    %c0_i32_1 = arith.constant 0 : i32
    return %c0_i32, %c0_i32_0 : i32, i32
  }
  func.func @transform_2(%arg0: i32) -> (i32, i32) {
    %c0_i32 = arith.constant 0 : i32
    %c0_i32_0 = arith.constant 0 : i32
    %c0_i32_1 = arith.constant 0 : i32
    return %c0_i32, %c0_i32_0 : i32, i32
  }
  func.func @transform_3(%arg0: i32) -> (i32, i32) {
    %c0_i32 = arith.constant 0 : i32
    %c0_i32_0 = arith.constant 0 : i32
    return %arg0, %c0_i32 : i32, i32
  }
}

module attributes {stable_mosaic.version = 11 : i64} {
  func.func @_attn_kernel(%arg0: i32, %arg1: i32, %arg2: memref<1x64x4xf32, #tpu.memory_space<vmem>>, %arg3: memref<1x64x4xf32, #tpu.memory_space<vmem>>, %arg4: memref<1x64x4xf32, #tpu.memory_space<vmem>>, %arg5: memref<1x64x4xf32, #tpu.memory_space<vmem>>) attributes {dimension_semantics = [#tpu.dimension_semantics<parallel>, #tpu.dimension_semantics<parallel>], iteration_bounds = array<i64: 16, 1>, scalar_prefetch = 0 : i64, scratch_operands = 0 : i64, tpu.core_type = #tpu.core_type<tc>, window_params = [{transform_indices = @transform_0, window_bounds = array<i64: 1, 64, 4>}, {transform_indices = @transform_1, window_bounds = array<i64: 1, 64, 4>}, {transform_indices = @transform_2, window_bounds = array<i64: 1, 64, 4>}, {transform_indices = @transform_3, window_bounds = array<i64: 1, 64, 4>}]} {
    %c0 = arith.constant 0 : index
    %c0_0 = arith.constant 0 : index
    %c0_1 = arith.constant 0 : index
    %0 = vector.load %arg2[%c0, %c0_0, %c0_1] : memref<1x64x4xf32, #tpu.memory_space<vmem>>, vector<1x64x4xf32>
    %1 = vector.shape_cast %0 : vector<1x64x4xf32> to vector<64x4xf32>
    %c0_2 = arith.constant 0 : index
    %c0_3 = arith.constant 0 : index
    %c0_4 = arith.constant 0 : index
    %2 = vector.load %arg3[%c0_2, %c0_3, %c0_4] : memref<1x64x4xf32, #tpu.memory_space<vmem>>, vector<1x64x4xf32>
    %3 = vector.shape_cast %2 : vector<1x64x4xf32> to vector<64x4xf32>
    %c0_5 = arith.constant 0 : index
    %c0_6 = arith.constant 0 : index
    %c0_7 = arith.constant 0 : index
    %4 = vector.load %arg4[%c0_5, %c0_6, %c0_7] : memref<1x64x4xf32, #tpu.memory_space<vmem>>, vector<1x64x4xf32>
    %5 = vector.shape_cast %4 : vector<1x64x4xf32> to vector<64x4xf32>
    %cst = arith.constant dense<0.000000e+00> : vector<64x64xf32>
    %6 = tpu.matmul %1, %3, %cst {dimension_numbers = #tpu.dot_dimension_numbers<[1], [1], [0], [0], [0, 0, 1, 0], [], []>} : vector<64x4xf32>, vector<64x4xf32>, vector<64x64xf32> -> vector<64x64xf32>
    %cst_8 = arith.constant 5.000000e-01 : f32
    %7 = vector.broadcast %cst_8 : f32 to vector<64x64xf32>
    %8 = arith.mulf %6, %7 : vector<64x64xf32>
    %cst_9 = arith.constant dense<0xFF800000> : vector<64xf32>
    %9 = vector.multi_reduction <maximumf>, %8, %cst_9 [1] : vector<64x64xf32> to vector<64xf32>
    %10 = vector.shape_cast %9 : vector<64xf32> to vector<64x1xf32>
    %11 = vector.broadcast %10 : vector<64x1xf32> to vector<64x64xf32>
    %12 = arith.subf %8, %11 : vector<64x64xf32>
    %13 = math.exp %12 : vector<64x64xf32>
    %cst_10 = arith.constant dense<0.000000e+00> : vector<64xf32>
    %14 = vector.multi_reduction <add>, %13, %cst_10 [1] : vector<64x64xf32> to vector<64xf32>
    %15 = vector.shape_cast %14 : vector<64xf32> to vector<64x1xf32>
    %16 = tpu.reciprocal %15 : vector<64x1xf32> -> vector<64x1xf32>
    %17 = vector.broadcast %16 : vector<64x1xf32> to vector<64x64xf32>
    %18 = arith.mulf %13, %17 : vector<64x64xf32>
    %cst_11 = arith.constant dense<0.000000e+00> : vector<64x4xf32>
    %19 = tpu.matmul %18, %5, %cst_11 {dimension_numbers = #tpu.dot_dimension_numbers<[1], [0], [0], [1], [0, 0, 1, 1], [], []>} : vector<64x64xf32>, vector<64x4xf32>, vector<64x4xf32> -> vector<64x4xf32>
    %c0_12 = arith.constant 0 : index
    %c0_13 = arith.constant 0 : index
    %c0_14 = arith.constant 0 : index
    %20 = vector.load %arg5[%c0_12, %c0_13, %c0_14] : memref<1x64x4xf32, #tpu.memory_space<vmem>>, vector<1x64x4xf32>
    %21 = vector.shape_cast %20 : vector<1x64x4xf32> to vector<64x4xf32>
    %22 = vector.shape_cast %19 : vector<64x4xf32> to vector<1x64x4xf32>
    tpu.vector_store %arg5[%c0_12, %c0_13, %c0_14], %22 {strides = array<i32>} : memref<1x64x4xf32, #tpu.memory_space<vmem>>, vector<1x64x4xf32>,
    return
  }
  func.func @transform_0(%arg0: i32, %arg1: i32) -> (i32, i32, i32) {
    %c0_i32 = arith.constant 0 : i32
    %c0_i32_0 = arith.constant 0 : i32
    return %arg0, %arg1, %c0_i32 : i32, i32, i32
  }
  func.func @transform_1(%arg0: i32, %arg1: i32) -> (i32, i32, i32) {
    %c0_i32 = arith.constant 0 : i32
    %c0_i32_0 = arith.constant 0 : i32
    %c0_i32_1 = arith.constant 0 : i32
    return %arg0, %c0_i32, %c0_i32_0 : i32, i32, i32
  }
  func.func @transform_2(%arg0: i32, %arg1: i32) -> (i32, i32, i32) {
    %c0_i32 = arith.constant 0 : i32
    %c0_i32_0 = arith.constant 0 : i32
    %c0_i32_1 = arith.constant 0 : i32
    return %arg0, %c0_i32, %c0_i32_0 : i32, i32, i32
  }
  func.func @transform_3(%arg0: i32, %arg1: i32) -> (i32, i32, i32) {
    %c0_i32 = arith.constant 0 : i32
    %c0_i32_0 = arith.constant 0 : i32
    return %arg0, %arg1, %c0_i32 : i32, i32, i32
  }
}

module attributes {stable_mosaic.version = 11 : i64} {
  func.func @_linear_kernel(%arg0: i32, %arg1: memref<128x32xf32, #tpu.memory_space<vmem>>, %arg2: memref<32x32xf32, #tpu.memory_space<vmem>>, %arg3: memref<1x32xf32, #tpu.memory_space<vmem>>, %arg4: memref<128x32xf32, #tpu.memory_space<vmem>>) attributes {dimension_semantics = [#tpu.dimension_semantics<parallel>], iteration_bounds = array<i64: 1>, scalar_prefetch = 0 : i64, scratch_operands = 0 : i64, tpu.core_type = #tpu.core_type<tc>, window_params = [{transform_indices = @transform_0, window_bounds = array<i64: 128, 32>}, {pipeline_mode = #tpu.pipeline_mode<synchronous>, transform_indices = @transform_1, window_bounds = array<i64: 32, 32>}, {pipeline_mode = #tpu.pipeline_mode<synchronous>, transform_indices = @transform_2, window_bounds = array<i64: 1, 32>}, {transform_indices = @transform_3, window_bounds = array<i64: 128, 32>}]} {
    %c0 = arith.constant 0 : index
    %c0_0 = arith.constant 0 : index
    %0 = vector.load %arg1[%c0, %c0_0] : memref<128x32xf32, #tpu.memory_space<vmem>>, vector<128x32xf32>
    %c0_1 = arith.constant 0 : index
    %c0_2 = arith.constant 0 : index
    %1 = vector.load %arg2[%c0_1, %c0_2] : memref<32x32xf32, #tpu.memory_space<vmem>>, vector<32x32xf32>
    %cst = arith.constant dense<0.000000e+00> : vector<128x32xf32>
    %2 = tpu.matmul %0, %1, %cst {dimension_numbers = #tpu.dot_dimension_numbers<[1], [0], [0], [1], [0, 0, 1, 1], [], []>} : vector<128x32xf32>, vector<32x32xf32>, vector<128x32xf32> -> vector<128x32xf32>
    %c0_3 = arith.constant 0 : index
    %c0_4 = arith.constant 0 : index
    %3 = vector.load %arg3[%c0_3, %c0_4] : memref<1x32xf32, #tpu.memory_space<vmem>>, vector<1x32xf32>
    %4 = vector.broadcast %3 : vector<1x32xf32> to vector<128x32xf32>
    %5 = arith.addf %2, %4 : vector<128x32xf32>
    %c0_5 = arith.constant 0 : index
    %c0_6 = arith.constant 0 : index
    %6 = vector.load %arg4[%c0_5, %c0_6] : memref<128x32xf32, #tpu.memory_space<vmem>>, vector<128x32xf32>
    tpu.vector_store %arg4[%c0_5, %c0_6], %5 {strides = array<i32>} : memref<128x32xf32, #tpu.memory_space<vmem>>, vector<128x32xf32>,
    return
  }
  func.func @transform_0(%arg0: i32) -> (i32, i32) {
    %c0_i32 = arith.constant 0 : i32
    %c0_i32_0 = arith.constant 0 : i32
    return %arg0, %c0_i32 : i32, i32
  }
  func.func @transform_1(%arg0: i32) -> (i32, i32) {
    %c0_i32 = arith.constant 0 : i32
    %c0_i32_0 = arith.constant 0 : i32
    %c0_i32_1 = arith.constant 0 : i32
    return %c0_i32, %c0_i32_0 : i32, i32
  }
  func.func @transform_2(%arg0: i32) -> (i32, i32) {
    %c0_i32 = arith.constant 0 : i32
    %c0_i32_0 = arith.constant 0 : i32
    %c0_i32_1 = arith.constant 0 : i32
    return %c0_i32, %c0_i32_0 : i32, i32
  }
  func.func @transform_3(%arg0: i32) -> (i32, i32) {
    %c0_i32 = arith.constant 0 : i32
    %c0_i32_0 = arith.constant 0 : i32
    return %arg0, %c0_i32 : i32, i32
  }
}

</mosaic_0001>

<bundles_post_ra>
// kernel: _lambda_.3
= control target key start
LH: loop header
LB: loop body
LE: loop exit
PB: predicated region body
PF: predicated region fallthrough
CT: control target
= control target key end

     0   :  { %vm41_vm0 = vcmask 261120   ;;  %vm235_vm1 = vcmask 785408   ;;  %s500_s1 = inlined_call_operand.vmem [shape: f32[32,96], index: 1, kind: input, shape index: {}]   ;;  %s501_s0 = inlined_call_operand.vmem [shape: f32[128,32], index: 0, kind: input, shape index: {}]   ;;  %s502_s2 = inlined_call_operand.vmem [shape: f32[1,96], index: 2, kind: input, shape index: {}]   ;;  %s503_s3 = inlined_call_operand.vmem [shape: f32[128,96], index: 3, kind: output, shape index: {}]  }
   0x1   :  { %v30_v0 = vld [vmem:[%s500_s1] sm:$0xff]  ;;  %v31_v1 = vld [vmem:[%s500_s1 + $0x8] sm:$0xff]  ;;  %v32_v2 = vld [vmem:[%s500_s1 + $0x10] sm:$0xff] }
   0x2   :  { %v325_v3 = vpack.c.bf16 %v31_v1, %v30_v0  ;;  %v33_v4 = vld [vmem:[%s500_s1 + $0x18] sm:$0xff]  ;;  %v14_v5 = vld [vmem:[%s501_s0] sm:$0xff]  ;;  %v15_v8 = vld [vmem:[%s501_s0 + $0x8] sm:$0xff] }
   0x3   :  { %v22_v6 = vld [vmem:[%s501_s0 + $0x40] sm:$0xff]  ;;  %v329_v7 = vpack.c.bf16 %v33_v4, %v32_v2  ;;  %301 = vmatprep.mubr.msk.f32.mxu0 %vm41_vm0, %v14_v5  ;;  %v23_v9 = vld [vmem:[%s501_s0 + $0x48] sm:$0xff]  ;;  %v16_v10 = vld [vmem:[%s501_s0 + $0x10] sm:$0xff] }
   0x4   :  { %313 = vmatprep.mubr.msk.f32.mxu1 %vm41_vm0, %v22_v6  ;;  %326 = vmatprep.subr.bf16.mxu0 %v325_v3  ;;  %v24_v11 = vld [vmem:[%s501_s0 + $0x50] sm:$0xff]  ;;  %v17_v12 = vld [vmem:[%s501_s0 + $0x18] sm:$0xff]  ;;  %v18_v14 = vld [vmem:[%s501_s0 + $0x20] sm:$0xff] }
   0x5   :  { %333 = vmatprep.subr.bf16.mxu1 %v325_v3  ;;  %328 = vmatpush3.bf16.msra.mxu0 %v325_v3  ;;  %v25_v13 = vld [vmem:[%s501_s0 + $0x58] sm:$0xff]  ;;  %v26_v15 = vld [vmem:[%s501_s0 + $0x60] sm:$0xff]  ;;  %v19_v16 = vld [vmem:[%s501_s0 + $0x28] sm:$0xff] }
   0x6   :  { %335 = vmatpush3.bf16.msra.mxu1 %v325_v3  ;;  %330 = vmatprep.subr.bf16.mxu0 %v329_v7  ;;  %v27_v17 = vld [vmem:[%s501_s0 + $0x68] sm:$0xff]  ;;  %v20_v18 = vld [vmem:[%s501_s0 + $0x30] sm:$0xff]  ;;  %v21_v20 = vld [vmem:[%s501_s0 + $0x38] sm:$0xff] }
   0x7   :  { %334 = vmatprep.subr.bf16.mxu1 %v329_v7  ;;  %v28_v19 = vld [vmem:[%s501_s0 + $0x70] sm:$0xff]  ;;  %v29_v21 = vld [vmem:[%s501_s0 + $0x78] sm:$0xff]  ;;  %v256_v22 = vld [vmem:[%s502_s2] ss:$0 sm:$0xff] }
   0x9   :  { %332 = vmatpush3.bf16.msra.mxu0 %v329_v7 }
   0xa   :  { %336 = vmatpush3.bf16.msra.mxu1 %v329_v7 }
   0xc   :  { %302 = vmatmul.mubr.msk.f32.vlgmr.msra.gmra.mrb[0].mxu0 %vm41_vm0, %v15_v8 }
   0xd   :  { %314 = vmatmul.mubr.msk.f32.vlgmr.msra.gmra.mrb[0].mxu1 %vm41_vm0, %v23_v9  ;;  %304 = vmatprep.mubr.msk.f32.mxu0 %vm41_vm0, %v16_v10 }
   0xe   :  { %316 = vmatprep.mubr.msk.f32.mxu1 %vm41_vm0, %v24_v11 }
  0x10   :  { %305 = vmatmul.mubr.msk.f32.gmra.mrb[2].mxu0 %vm41_vm0, %v17_v12 }
  0x11   :  { %317 = vmatmul.mubr.msk.f32.gmra.mrb[2].mxu1 %vm41_vm0, %v25_v13  ;;  %307 = vmatprep.mubr.msk.f32.mxu0 %vm41_vm0, %v18_v14 }
  0x12   :  { %319 = vmatprep.mubr.msk.f32.mxu1 %vm41_vm0, %v26_v15 }
  0x14   :  { %308 = vmatmul.mubr.msk.f32.gmra.mrb[4].mxu0 %vm41_vm0, %v19_v16 }
  0x15   :  { %320 = vmatmul.mubr.msk.f32.gmra.mrb[4].mxu1 %vm41_vm0, %v27_v17  ;;  %310 = vmatprep.mubr.msk.f32.mxu0 %vm41_vm0, %v20_v18 }
  0x16   :  { %322 = vmatprep.mubr.msk.f32.mxu1 %vm41_vm0, %v28_v19 }
  0x18   :  { %311 = vmatmul.mubr.msk.f32.gmra.mrb[6].mxu0 %vm41_vm0, %v21_v20 }
  0x19   :  { %323 = vmatmul.mubr.msk.f32.gmra.mrb[6].mxu1 %vm41_vm0, %v29_v21 }
  0xdf   :  { %v303_v23 = vpop.f32.mrb[0].mxu0 }
  0xe0   :  { %v315_v24 = vpop.f32.mrb[0].mxu1  ;;  %v162_v25 = vadd.f32 %v303_v23, %v256_v22  ;;  %v156_v27 = vpop.f32.mrb[1].mxu0 }
  0xe1   :  { %v202_v26 = vadd.f32 %v315_v24, %v256_v22  ;;  %v196_v28 = vpop.f32.mrb[1].mxu1  ;;  %v157_v29 = vadd.f32 %v256_v22, %v156_v27 }
  0xe2   :  { %v197_v30 = vadd.f32 %v256_v22, %v196_v28  ;;  %237 = vst.msk [vmem:[%s503_s3 + $0x8] sm:$0xff] %vm235_vm1, %v162_v25 }
  0xe3   :  { %245 = vst.msk [vmem:[%s503_s3 + $0x48] sm:$0xff] %vm235_vm1, %v202_v26  ;;  %236 = vst.msk [vmem:[%s503_s3] sm:$0xff] %vm235_vm1, %v157_v29  ;;  %v306_v31 = vpop.f32.mrb[2].mxu0 }
  0xe4   :  { %244 = vst.msk [vmem:[%s503_s3 + $0x40] sm:$0xff] %vm235_vm1, %v197_v30  ;;  %v318_v32 = vpop.f32.mrb[2].mxu1  ;;  %v172_v33 = vadd.f32 %v306_v31, %v256_v22  ;;  %v166_v35 = vpop.f32.mrb[3].mxu0 }
  0xe5   :  { %v212_v34 = vadd.f32 %v318_v32, %v256_v22  ;;  %v206_v36 = vpop.f32.mrb[3].mxu1  ;;  %v167_v37 = vadd.f32 %v256_v22, %v166_v35 }
  0xe6   :  { %v207_v38 = vadd.f32 %v256_v22, %v206_v36  ;;  %239 = vst.msk [vmem:[%s503_s3 + $0x18] sm:$0xff] %vm235_vm1, %v172_v33 }
  0xe7   :  { %247 = vst.msk [vmem:[%s503_s3 + $0x58] sm:$0xff] %vm235_vm1, %v212_v34  ;;  %238 = vst.msk [vmem:[%s503_s3 + $0x10] sm:$0xff] %vm235_vm1, %v167_v37  ;;  %v309_v39 = vpop.f32.mrb[4].mxu0 }
  0xe8   :  { %246 = vst.msk [vmem:[%s503_s3 + $0x50] sm:$0xff] %vm235_vm1, %v207_v38  ;;  %v321_v40 = vpop.f32.mrb[4].mxu1  ;;  %v182_v41 = vadd.f32 %v309_v39, %v256_v22  ;;  %v176_v43 = vpop.f32.mrb[5].mxu0 }
  0xe9   :  { %v222_v42 = vadd.f32 %v321_v40, %v256_v22  ;;  %v216_v44 = vpop.f32.mrb[5].mxu1  ;;  %v177_v45 = vadd.f32 %v256_v22, %v176_v43 }
  0xea   :  { %v217_v46 = vadd.f32 %v256_v22, %v216_v44  ;;  %241 = vst.msk [vmem:[%s503_s3 + $0x28] sm:$0xff] %vm235_vm1, %v182_v41 }
  0xeb   :  { %249 = vst.msk [vmem:[%s503_s3 + $0x68] sm:$0xff] %vm235_vm1, %v222_v42  ;;  %240 = vst.msk [vmem:[%s503_s3 + $0x20] sm:$0xff] %vm235_vm1, %v177_v45  ;;  %v312_v47 = vpop.f32.mrb[6].mxu0 }
  0xec   :  { %248 = vst.msk [vmem:[%s503_s3 + $0x60] sm:$0xff] %vm235_vm1, %v217_v46  ;;  %v324_v48 = vpop.f32.mrb[6].mxu1  ;;  %v192_v49 = vadd.f32 %v312_v47, %v256_v22  ;;  %v186_v51 = vpop.f32.mrb[7].mxu0 }
  0xed   :  { %v232_v50 = vadd.f32 %v324_v48, %v256_v22  ;;  %v226_v52 = vpop.f32.mrb[7].mxu1  ;;  %v187_v53 = vadd.f32 %v256_v22, %v186_v51 }
  0xee   :  { %v227_v54 = vadd.f32 %v256_v22, %v226_v52  ;;  %243 = vst.msk [vmem:[%s503_s3 + $0x38] sm:$0xff] %vm235_vm1, %v192_v49 }
  0xef   :  { %251 = vst.msk [vmem:[%s503_s3 + $0x78] sm:$0xff] %vm235_vm1, %v232_v50  ;;  %242 = vst.msk [vmem:[%s503_s3 + $0x30] sm:$0xff] %vm235_vm1, %v187_v53 }
  0xf0   :  { %250 = vst.msk [vmem:[%s503_s3 + $0x70] sm:$0xff] %vm235_vm1, %v227_v54 }

// kernel: _lambda_.4
= control target key start
LH: loop header
LB: loop body
LE: loop exit
PB: predicated region body
PF: predicated region fallthrough
CT: control target
= control target key end

     0   :  { %s1044_s12 = smov 0   ;;  %s1046_s13 = smov 0   ;;  %s1189_s0 = inlined_call_operand.vmem [shape: f32[16,64,4], index: 0, kind: input, shape index: {}]   ;;  %s1190_s1 = inlined_call_operand.vmem [shape: f32[16,64,4], index: 1, kind: input, shape index: {}]   ;;  %s1191_s2 = inlined_call_operand.vmem [shape: f32[16,64,4], index: 2, kind: input, shape index: {}]   ;;  %s1192_s3 = inlined_call_operand.vmem [shape: f32[16,64,4], index: 3, kind: output, shape index: {}]  }
   0x1   :  { %s1048_s14 = smov 0  }
   0x2 LB: > { %s25_s15 = sadd.s32 1, %s1018_s13  ;;  %p777_p0 = scmp.ge.s32.totalorder %s1022_s14, 1  ;;  %s1022_s14 = sphi %s1048_s14, %s13_s14   ;;  %s1018_s13 = sphi %s1046_s13, %s1196_s13   ;;  %s1014_s12 = sphi %s1044_s12, %s1195_s12  }
   0x3   : > { %p27_p1 = scmp.ge.s32.totalorder %s25_s15, 16  ;;  %p178_p2 = scmp.lt.s32.totalorder %s1022_s14, 17 }
   0x5   : > { %s1198_s15 = smov (%p27_p1, %s25_s15), 0  ;;  %p179_p3 = pnand %p777_p0, %p178_p2 }
   0x6   : > { %p221_p4 = scmp.lt.s32.totalorder (!%p179_p3), %s1014_s12, 15  ;;  %vm274_vm0 = vcmask (!%p179_p3), 31744   ;;  %vm436_vm2 = vcmask (!%p179_p3), 523264  }
   0x7   : > { %182 = sbr.rel (%p179_p3) target bundleno = 811 (0x32b), region = 32  ;;  %vm1070_vm1 = vmpackc.low (!%p179_p3), %vm274_vm0, %vm274_vm0 }
   0xe   : > { %s1200_s12 = smov (!%p221_p4, %s1014_s12), 15 }
   0xf   : > { %s1062_s16 = sshll.u32 %s1200_s12, 6 }
  0x10   : > { %s234_s19 = scalar_lea.vmem %s1190_s1, %s1062_s16  ;;  %s1078_s22 = scalar_lea.vmem %s1189_s0, %s1062_s16 }
  0x11   : > { %v258_v1 = vld [vmem:[%s234_s19] sm:$0xff]  ;;  %v259_v2 = vld [vmem:[%s234_s19 + $0x8] sm:$0xff]  ;;  %v260_v3 = vld [vmem:[%s234_s19 + $0x10] sm:$0xff]  ;;  %s239_s25 = scalar_lea.vmem %s1191_s2, %s1062_s16  ;;  %s248_s28 = scalar_lea.vmem %s1192_s3, %s1062_s16 }
  0x12   : > { %v904_v4 = vpack.c.bf16 %v259_v2, %v258_v1  ;;  %v261_v5 = vld [vmem:[%s234_s19 + $0x18] sm:$0xff]  ;;  %v250_v7 = vld [vmem:[%s1078_s22] sm:$0xff]  ;;  %v263_v9 = vld [vmem:[%s234_s19 + $0x28] sm:$0xff] }
  0x13   : > { %v910_v6 = vpack.c.bf16 %v261_v5, %v260_v3  ;;  %864 = vmatprep.mubr.msk.f32.mxu0 %vm274_vm0, %v250_v7  ;;  %v262_v8 = vld [vmem:[%s234_s19 + $0x20] sm:$0xff]  ;;  %v264_v11 = vld [vmem:[%s234_s19 + $0x30] sm:$0xff]  ;;  %v265_v12 = vld [vmem:[%s234_s19 + $0x38] sm:$0xff] }
  0x14   : > { %906 = vmatprep.subr.msk.bf16.mxu0 %vm1070_vm1, %v904_v4  ;;  %v916_v10 = vpack.c.bf16 %v263_v9, %v262_v8  ;;  %v922_v13 = vpack.c.bf16 %v265_v12, %v264_v11  ;;  %v251_v14 = vld [vmem:[%s1078_s22 + $0x8] sm:$0xff]  ;;  %v252_v15 = vld [vmem:[%s1078_s22 + $0x10] sm:$0xff]  ;;  %v253_v16 = vld [vmem:[%s1078_s22 + $0x18] sm:$0xff] }
  0x15   : > { %909 = vmatpush3.bf16.xpose.msk.msra.mxu0 %vm1070_vm1, %v904_v4  ;;  %v254_v17 = vld [vmem:[%s1078_s22 + $0x20] sm:$0xff]  ;;  %v255_v18 = vld [vmem:[%s1078_s22 + $0x28] sm:$0xff]  ;;  %v256_v19 = vld [vmem:[%s1078_s22 + $0x30] sm:$0xff] }
  0x16   : > { %912 = vmatprep.subr.msk.bf16.mxu0 %vm1070_vm1, %v910_v6  ;;  %v257_v20 = vld [vmem:[%s1078_s22 + $0x38] sm:$0xff] }
  0x1d   : > { %915 = vmatpush3.bf16.xpose.msk.msra.mxu0 %vm1070_vm1, %v910_v6 }
  0x1e   : > { %918 = vmatprep.subr.msk.bf16.mxu0 %vm1070_vm1, %v916_v10 }
  0x25   : > { %921 = vmatpush3.bf16.xpose.msk.msra.mxu0 %vm1070_vm1, %v916_v10 }
  0x26   : > { %924 = vmatprep.subr.msk.bf16.mxu0 %vm1070_vm1, %v922_v13 }
  0x2d   : > { %927 = vmatpush3.bf16.xpose.msk.msra.mxu0 %vm1070_vm1, %v922_v13 }
  0x34   : > { %865 = vmatmul.mubr.msk.f32.vlgmr.msra.gmra.mrb[0].mxu0 %vm274_vm0, %v251_v14 }
  0x35   : > { %867 = vmatprep.mubr.msk.f32.mxu0 %vm274_vm0, %v252_v15 }
  0x38   : > { %868 = vmatmul.mubr.msk.f32.gmra.mrb[2].mxu0 %vm274_vm0, %v253_v16 }
  0x39   : > { %870 = vmatprep.mubr.msk.f32.mxu0 %vm274_vm0, %v254_v17 }
  0x3c   : > { %871 = vmatmul.mubr.msk.f32.gmra.mrb[4].mxu0 %vm274_vm0, %v255_v18 }
  0x3d   : > { %873 = vmatprep.mubr.msk.f32.mxu0 %vm274_vm0, %v256_v19  ;;  %v266_v19 = vld [vmem:[%s239_s25] sm:$0xff] }
  0x40   : > { %874 = vmatmul.mubr.msk.f32.gmra.mrb[6].mxu0 %vm274_vm0, %v257_v20  ;;  %v267_v20 = vld [vmem:[%s239_s25 + $0x8] sm:$0xff] }
 0x107   : > { %v866_v21 = vpop.f32.mrb[0].mxu0 }
 0x108   : > { %v389_v22 = vpop.f32.mrb[1].mxu0  ;;  %v429_v24 = vmul.f32 0.5, %v866_v21 }
 0x109   : > { %v428_v23 = vmul.f32 0.5, %v389_v22  ;;  %v928_v22 = vpack.c.bf16 %v267_v20, %v266_v19 }
 0x10a   : > { %v440_v31 = vsel %vm436_vm2, %v429_v24, -inf }
 0x10b   : > { %v869_v25 = vpop.f32.mrb[2].mxu0  ;;  %v437_v26 = vsel %vm436_vm2, %v428_v23, -inf  ;;  %929 = vmatprep.subr.bf16.mxu1 %v928_v22 }
 0x10c   : > { %438 = vmax.xlane.f32.xlu0 %v437_v26  ;;  %v399_v27 = vpop.f32.mrb[3].mxu0  ;;  %v431_v29 = vmul.f32 0.5, %v869_v25  ;;  %931 = vmatpush3.bf16.msra.mxu1 %v928_v22  ;;  %v269_v25 = vld [vmem:[%s239_s25 + $0x18] sm:$0xff] }
 0x10d   : > { %v430_v28 = vmul.f32 0.5, %v399_v27  ;;  %v270_v27 = vld [vmem:[%s239_s25 + $0x20] sm:$0xff] }
 0x10e   : > { %v446_v37 = vsel %vm436_vm2, %v431_v29, -inf }
 0x10f   : > { %v872_v30 = vpop.f32.mrb[4].mxu0  ;;  %v443_v32 = vsel %vm436_vm2, %v430_v28, -inf }
 0x110   : > { %441 = vmax.xlane.f32.xlu0 %v440_v31  ;;  %444 = vmax.xlane.f32.xlu1 %v443_v32  ;;  %v409_v33 = vpop.f32.mrb[5].mxu0  ;;  %v433_v35 = vmul.f32 0.5, %v872_v30  ;;  %v272_v30 = vld [vmem:[%s239_s25 + $0x30] sm:$0xff]  ;;  %v273_v31 = vld [vmem:[%s239_s25 + $0x38] sm:$0xff] }
 0x111   : > { %v432_v34 = vmul.f32 0.5, %v409_v33  ;;  %v940_v32 = vpack.c.bf16 %v273_v31, %v272_v30 }
 0x112   : > { %v452_v42 = vsel %vm436_vm2, %v433_v35, -inf }
 0x113   : > { %v875_v36 = vpop.f32.mrb[6].mxu0  ;;  %v449_v38 = vsel %vm436_vm2, %v432_v34, -inf }
 0x114   : > { %447 = vmax.xlane.f32.xlu1 %v446_v37  ;;  %450 = vmax.xlane.f32.xlu0 %v449_v38  ;;  %v419_v39 = vpop.f32.mrb[7].mxu0  ;;  %v435_v41 = vmul.f32 0.5, %v875_v36 }
 0x115   : > { %v434_v40 = vmul.f32 0.5, %v419_v39 }
 0x116   : > { %v458_v44 = vsel %vm436_vm2, %v435_v41, -inf }
 0x117   : > { %v455_v43 = vsel %vm436_vm2, %v434_v40, -inf }
 0x118   : > { %453 = vmax.xlane.f32.xlu1 %v452_v42  ;;  %456 = vmax.xlane.f32.xlu0 %v455_v43 }
 0x11c   : > { %459 = vmax.xlane.f32.xlu1 %v458_v44 }
 0x199   : > { %v439_v45 = vpop.xlane.xlu0 %438 }
 0x19a   : > { %v461_v46 = vsub.f32 %v428_v23, %v439_v45 }
 0x19c   : > { %v469_v47 = vmul.f32 1.442695, %v461_v46 }
 0x19d   : > { %v442_v48 = vpop.xlane.xlu0 %441  ;;  %v445_v49 = vpop.xlane.xlu1 %444 }
 0x19e   : > { %968 = vpow2.f32 %v469_v47  ;;  %v462_v50 = vsub.f32 %v429_v24, %v442_v48  ;;  %v463_v51 = vsub.f32 %v430_v28, %v445_v49  ;;  %v268_v24 = vld [vmem:[%s239_s25 + $0x10] sm:$0xff]  ;;  %v271_v28 = vld [vmem:[%s239_s25 + $0x28] sm:$0xff] }
 0x19f   : > { %v932_v26 = vpack.c.bf16 %v269_v25, %v268_v24 }
 0x1a0   : > { %v471_v52 = vmul.f32 1.442695, %v462_v50  ;;  %v473_v53 = vmul.f32 1.442695, %v463_v51 }
 0x1a1   : > { %v448_v54 = vpop.xlane.xlu1 %447  ;;  %v451_v55 = vpop.xlane.xlu0 %450  ;;  %933 = vmatprep.subr.bf16.mxu1 %v932_v26 }
 0x1a2   : > { %970 = vpow2.f32 %v471_v52  ;;  %v464_v56 = vsub.f32 %v431_v29, %v448_v54  ;;  %v465_v57 = vsub.f32 %v432_v34, %v451_v55  ;;  %935 = vmatpush3.bf16.msra.mxu1 %v932_v26  ;;  %v936_v29 = vpack.c.bf16 %v271_v28, %v270_v27 }
 0x1a3   : > { %972 = vpow2.f32 %v473_v53 }
 0x1a4   : > { %v475_v58 = vmul.f32 1.442695, %v464_v56  ;;  %v477_v59 = vmul.f32 1.442695, %v465_v57  ;;  %937 = vmatprep.subr.bf16.mxu1 %v936_v29 }
 0x1a5   : > { %v454_v60 = vpop.xlane.xlu1 %453  ;;  %v457_v61 = vpop.xlane.xlu0 %456 }
 0x1a6   : > { %974 = vpow2.f32 %v475_v58  ;;  %v466_v62 = vsub.f32 %v433_v35, %v454_v60  ;;  %v467_v63 = vsub.f32 %v434_v40, %v457_v61  ;;  %939 = vmatpush3.bf16.msra.mxu1 %v936_v29 }
 0x1a7   : > { %976 = vpow2.f32 %v477_v59  ;;  %941 = vmatprep.subr.bf16.mxu1 %v940_v32 }
 0x1a8   : > { %v1120_v0 = vpop.eup %968  ;;  %v479_v1 = vmul.f32 1.442695, %v466_v62  ;;  %v481_v2 = vmul.f32 1.442695, %v467_v63 }
 0x1a9   : > { %v460_v3 = vpop.xlane.xlu1 %459  ;;  %v485_v4 = vsel %vm436_vm2, %v1120_v0, 0.0 }
 0x1aa   : > { %978 = vpow2.f32 %v479_v1  ;;  %v468_v5 = vsub.f32 %v435_v41, %v460_v3  ;;  %486 = vadd.xlane.f32.xlu0 %v485_v4  ;;  %943 = vmatpush3.bf16.msra.mxu1 %v940_v32 }
 0x1ab   : > { %980 = vpow2.f32 %v481_v2 }
 0x1ac   : > { %v1124_v6 = vpop.eup %970  ;;  %v483_v7 = vmul.f32 1.442695, %v468_v5 }
 0x1ad   : > { %v1126_v8 = vpop.eup %972  ;;  %v488_v9 = vsel %vm436_vm2, %v1124_v6, 0.0 }
 0x1ae   : > { %982 = vpow2.f32 %v483_v7  ;;  %489 = vadd.xlane.f32.xlu1 %v488_v9  ;;  %v491_v10 = vsel %vm436_vm2, %v1126_v8, 0.0 }
 0x1af   : > { %492 = vadd.xlane.f32.xlu0 %v491_v10 }
 0x1b0   : > { %v1132_v11 = vpop.eup %974 }
 0x1b1   : > { %v1134_v12 = vpop.eup %976  ;;  %v494_v13 = vsel %vm436_vm2, %v1132_v11, 0.0 }
 0x1b2   : > { %495 = vadd.xlane.f32.xlu1 %v494_v13  ;;  %v497_v14 = vsel %vm436_vm2, %v1134_v12, 0.0 }
 0x1b3   : > { %498 = vadd.xlane.f32.xlu0 %v497_v14 }
 0x1b4   : > { %v1140_v15 = vpop.eup %978 }
 0x1b5   : > { %v1142_v16 = vpop.eup %980  ;;  %v500_v17 = vsel %vm436_vm2, %v1140_v15, 0.0 }
 0x1b6   : > { %501 = vadd.xlane.f32.xlu1 %v500_v17  ;;  %v503_v18 = vsel %vm436_vm2, %v1142_v16, 0.0 }
 0x1b7   : > { %504 = vadd.xlane.f32.xlu0 %v503_v18 }
 0x1b8   : > { %v983_v21 = vpop.eup %982 }
 0x1b9   : > { %v506_v23 = vsel %vm436_vm2, %v983_v21, 0.0 }
 0x1ba   : > { %507 = vadd.xlane.f32.xlu1 %v506_v23 }
 0x237   : > { %v487_v33 = vpop.xlane.xlu0 %486 }
 0x238   : > { %984 = vrcp.f32 %v487_v33 }
 0x23b   : > { %v490_v34 = vpop.xlane.xlu1 %489 }
 0x23c   : > { %986 = vrcp.f32 %v490_v34  ;;  %v493_v35 = vpop.xlane.xlu0 %492 }
 0x23d   : > { %988 = vrcp.f32 %v493_v35 }
 0x23f   : > { %v496_v36 = vpop.xlane.xlu1 %495 }
 0x240   : > { %990 = vrcp.f32 %v496_v36  ;;  %v499_v37 = vpop.xlane.xlu0 %498 }
 0x241   : > { %992 = vrcp.f32 %v499_v37 }
 0x242   : > { %v985_v38 = vpop.eup %984 }
 0x243   : > { %v502_v39 = vpop.xlane.xlu1 %501  ;;  %v517_v40 = vmul.f32 %v985_v38, %v1120_v0 }
 0x244   : > { %994 = vrcp.f32 %v502_v39  ;;  %v505_v41 = vpop.xlane.xlu0 %504 }
 0x245   : > { %996 = vrcp.f32 %v505_v41  ;;  %892 = vmatprep.mubr.msk.f32.mxu1 %vm436_vm2, %v517_v40 }
 0x246   : > { %v987_v42 = vpop.eup %986 }
 0x247   : > { %v989_v43 = vpop.eup %988  ;;  %v508_v44 = vpop.xlane.xlu1 %507  ;;  %v518_v45 = vmul.f32 %v987_v42, %v1124_v6 }
 0x248   : > { %998 = vrcp.f32 %v508_v44  ;;  %v519_v46 = vmul.f32 %v989_v43, %v1126_v8 }
 0x249   : > { %893 = vmatmul.mubr.msk.f32.vlgmr.msra.gmra.mrb[0].mxu1 %vm436_vm2, %v518_v45 }
 0x24a   : > { %v991_v47 = vpop.eup %990  ;;  %895 = vmatprep.mubr.msk.f32.mxu1 %vm436_vm2, %v519_v46 }
 0x24b   : > { %v993_v48 = vpop.eup %992  ;;  %v520_v49 = vmul.f32 %v991_v47, %v1132_v11 }
 0x24c   : > { %v521_v50 = vmul.f32 %v993_v48, %v1134_v12 }
 0x24d   : > { %896 = vmatmul.mubr.msk.f32.gmra.mrb[2].mxu1 %vm436_vm2, %v520_v49 }
 0x24e   : > { %v995_v51 = vpop.eup %994  ;;  %898 = vmatprep.mubr.msk.f32.mxu1 %vm436_vm2, %v521_v50 }
 0x24f   : > { %v997_v52 = vpop.eup %996  ;;  %v522_v53 = vmul.f32 %v995_v51, %v1140_v15 }
 0x250   : > { %v523_v54 = vmul.f32 %v997_v52, %v1142_v16 }
 0x251   : > { %899 = vmatmul.mubr.msk.f32.gmra.mrb[4].mxu1 %vm436_vm2, %v522_v53 }
 0x252   : > { %v999_v55 = vpop.eup %998  ;;  %901 = vmatprep.mubr.msk.f32.mxu1 %vm436_vm2, %v523_v54 }
 0x253   : > { %v524_v56 = vmul.f32 %v999_v55, %v983_v21 }
 0x255   : > { %902 = vmatmul.mubr.msk.f32.gmra.mrb[6].mxu1 %vm436_vm2, %v524_v56 }
 0x31c   : > { %v894_v57 = vpop.f32.mrb[0].mxu1 }
 0x31d   : > { %655 = vst.msk [vmem:[%s248_s28 + $0x8] sm:$0xff] %vm274_vm0, %v894_v57  ;;  %v615_v58 = vpop.f32.mrb[1].mxu1 }
 0x31e   : > { %654 = vst.msk [vmem:[%s248_s28] sm:$0xff] %vm274_vm0, %v615_v58 }
 0x320   : > { %v897_v59 = vpop.f32.mrb[2].mxu1 }
 0x321   : > { %657 = vst.msk [vmem:[%s248_s28 + $0x18] sm:$0xff] %vm274_vm0, %v897_v59  ;;  %v625_v60 = vpop.f32.mrb[3].mxu1 }
 0x322   : > { %656 = vst.msk [vmem:[%s248_s28 + $0x10] sm:$0xff] %vm274_vm0, %v625_v60 }
 0x324   : > { %v900_v61 = vpop.f32.mrb[4].mxu1 }
 0x325   : > { %659 = vst.msk [vmem:[%s248_s28 + $0x28] sm:$0xff] %vm274_vm0, %v900_v61  ;;  %v635_v62 = vpop.f32.mrb[5].mxu1 }
 0x326   : > { %658 = vst.msk [vmem:[%s248_s28 + $0x20] sm:$0xff] %vm274_vm0, %v635_v62 }
 0x328   : > { %v903_v63 = vpop.f32.mrb[6].mxu1 }
 0x329   : > { %661 = vst.msk [vmem:[%s248_s28 + $0x38] sm:$0xff] %vm274_vm0, %v903_v63  ;;  %v645_v0 = vpop.f32.mrb[7].mxu1 }
 0x32a   : > { %660 = vst.msk [vmem:[%s248_s28 + $0x30] sm:$0xff] %vm274_vm0, %v645_v0 }
 0x32b PF: > { %s13_s14 = sadd.s32 1, %s1022_s14   ;;  %s1195_s12 = smov %s1018_s13 }
 0x32c   : > { %p10_p5 = scmp.ge.s32.totalorder %s13_s14, 18   ;;  %s1196_s13 = smov %s1198_s15 }
 0x32e   :  { %12 = sbr.rel (!%p10_p5) target bundleno = 2 (0x2), region = 68 }

// kernel: _lambda_.5
= control target key start
LH: loop header
LB: loop body
LE: loop exit
PB: predicated region body
PF: predicated region fallthrough
CT: control target
= control target key end

     0   :  { %vm41_vm0 = vcmask 261120   ;;  %s499_s1 = inlined_call_operand.vmem [shape: f32[32,32], index: 1, kind: input, shape index: {}]   ;;  %s500_s0 = inlined_call_operand.vmem [shape: f32[128,32], index: 0, kind: input, shape index: {}]   ;;  %s501_s2 = inlined_call_operand.vmem [shape: f32[1,32], index: 2, kind: input, shape index: {}]   ;;  %s502_s3 = inlined_call_operand.vmem [shape: f32[128,32], index: 3, kind: output, shape index: {}]  }
   0x1   :  { %v30_v0 = vld [vmem:[%s499_s1] sm:$0xff]  ;;  %v31_v1 = vld [vmem:[%s499_s1 + $0x8] sm:$0xff]  ;;  %v32_v2 = vld [vmem:[%s499_s1 + $0x10] sm:$0xff] }
   0x2   :  { %v324_v3 = vpack.c.bf16 %v31_v1, %v30_v0  ;;  %v33_v4 = vld [vmem:[%s499_s1 + $0x18] sm:$0xff]  ;;  %v14_v5 = vld [vmem:[%s500_s0] sm:$0xff]  ;;  %v15_v8 = vld [vmem:[%s500_s0 + $0x8] sm:$0xff] }
   0x3   :  { %v22_v6 = vld [vmem:[%s500_s0 + $0x40] sm:$0xff]  ;;  %v328_v7 = vpack.c.bf16 %v33_v4, %v32_v2  ;;  %300 = vmatprep.mubr.msk.f32.mxu0 %vm41_vm0, %v14_v5  ;;  %v23_v9 = vld [vmem:[%s500_s0 + $0x48] sm:$0xff]  ;;  %v16_v10 = vld [vmem:[%s500_s0 + $0x10] sm:$0xff] }
   0x4   :  { %312 = vmatprep.mubr.msk.f32.mxu1 %vm41_vm0, %v22_v6  ;;  %325 = vmatprep.subr.bf16.mxu0 %v324_v3  ;;  %v24_v11 = vld [vmem:[%s500_s0 + $0x50] sm:$0xff]  ;;  %v17_v12 = vld [vmem:[%s500_s0 + $0x18] sm:$0xff]  ;;  %v18_v14 = vld [vmem:[%s500_s0 + $0x20] sm:$0xff] }
   0x5   :  { %332 = vmatprep.subr.bf16.mxu1 %v324_v3  ;;  %327 = vmatpush3.bf16.msra.mxu0 %v324_v3  ;;  %v25_v13 = vld [vmem:[%s500_s0 + $0x58] sm:$0xff]  ;;  %v26_v15 = vld [vmem:[%s500_s0 + $0x60] sm:$0xff]  ;;  %v19_v16 = vld [vmem:[%s500_s0 + $0x28] sm:$0xff] }
   0x6   :  { %334 = vmatpush3.bf16.msra.mxu1 %v324_v3  ;;  %329 = vmatprep.subr.bf16.mxu0 %v328_v7  ;;  %v27_v17 = vld [vmem:[%s500_s0 + $0x68] sm:$0xff]  ;;  %v20_v18 = vld [vmem:[%s500_s0 + $0x30] sm:$0xff]  ;;  %v21_v20 = vld [vmem:[%s500_s0 + $0x38] sm:$0xff] }
   0x7   :  { %333 = vmatprep.subr.bf16.mxu1 %v328_v7  ;;  %v28_v19 = vld [vmem:[%s500_s0 + $0x70] sm:$0xff]  ;;  %v29_v21 = vld [vmem:[%s500_s0 + $0x78] sm:$0xff]  ;;  %v255_v22 = vld [vmem:[%s501_s2] ss:$0 sm:$0xff] }
   0x9   :  { %331 = vmatpush3.bf16.msra.mxu0 %v328_v7 }
   0xa   :  { %335 = vmatpush3.bf16.msra.mxu1 %v328_v7 }
   0xc   :  { %301 = vmatmul.mubr.msk.f32.vlgmr.msra.gmra.mrb[0].mxu0 %vm41_vm0, %v15_v8 }
   0xd   :  { %313 = vmatmul.mubr.msk.f32.vlgmr.msra.gmra.mrb[0].mxu1 %vm41_vm0, %v23_v9  ;;  %303 = vmatprep.mubr.msk.f32.mxu0 %vm41_vm0, %v16_v10 }
   0xe   :  { %315 = vmatprep.mubr.msk.f32.mxu1 %vm41_vm0, %v24_v11 }
  0x10   :  { %304 = vmatmul.mubr.msk.f32.gmra.mrb[2].mxu0 %vm41_vm0, %v17_v12 }
  0x11   :  { %316 = vmatmul.mubr.msk.f32.gmra.mrb[2].mxu1 %vm41_vm0, %v25_v13  ;;  %306 = vmatprep.mubr.msk.f32.mxu0 %vm41_vm0, %v18_v14 }
  0x12   :  { %318 = vmatprep.mubr.msk.f32.mxu1 %vm41_vm0, %v26_v15 }
  0x14   :  { %307 = vmatmul.mubr.msk.f32.gmra.mrb[4].mxu0 %vm41_vm0, %v19_v16 }
  0x15   :  { %319 = vmatmul.mubr.msk.f32.gmra.mrb[4].mxu1 %vm41_vm0, %v27_v17  ;;  %309 = vmatprep.mubr.msk.f32.mxu0 %vm41_vm0, %v20_v18 }
  0x16   :  { %321 = vmatprep.mubr.msk.f32.mxu1 %vm41_vm0, %v28_v19 }
  0x18   :  { %310 = vmatmul.mubr.msk.f32.gmra.mrb[6].mxu0 %vm41_vm0, %v21_v20 }
  0x19   :  { %322 = vmatmul.mubr.msk.f32.gmra.mrb[6].mxu1 %vm41_vm0, %v29_v21 }
  0xdf   :  { %v302_v23 = vpop.f32.mrb[0].mxu0 }
  0xe0   :  { %v314_v24 = vpop.f32.mrb[0].mxu1  ;;  %v162_v25 = vadd.f32 %v302_v23, %v255_v22  ;;  %v156_v27 = vpop.f32.mrb[1].mxu0 }
  0xe1   :  { %v202_v26 = vadd.f32 %v314_v24, %v255_v22  ;;  %v196_v28 = vpop.f32.mrb[1].mxu1  ;;  %v157_v29 = vadd.f32 %v255_v22, %v156_v27 }
  0xe2   :  { %v197_v30 = vadd.f32 %v255_v22, %v196_v28  ;;  %236 = vst.msk [vmem:[%s502_s3 + $0x8] sm:$0xff] %vm41_vm0, %v162_v25 }
  0xe3   :  { %244 = vst.msk [vmem:[%s502_s3 + $0x48] sm:$0xff] %vm41_vm0, %v202_v26  ;;  %235 = vst.msk [vmem:[%s502_s3] sm:$0xff] %vm41_vm0, %v157_v29  ;;  %v305_v31 = vpop.f32.mrb[2].mxu0 }
  0xe4   :  { %243 = vst.msk [vmem:[%s502_s3 + $0x40] sm:$0xff] %vm41_vm0, %v197_v30  ;;  %v317_v32 = vpop.f32.mrb[2].mxu1  ;;  %v172_v33 = vadd.f32 %v305_v31, %v255_v22  ;;  %v166_v35 = vpop.f32.mrb[3].mxu0 }
  0xe5   :  { %v212_v34 = vadd.f32 %v317_v32, %v255_v22  ;;  %v206_v36 = vpop.f32.mrb[3].mxu1  ;;  %v167_v37 = vadd.f32 %v255_v22, %v166_v35 }
  0xe6   :  { %v207_v38 = vadd.f32 %v255_v22, %v206_v36  ;;  %238 = vst.msk [vmem:[%s502_s3 + $0x18] sm:$0xff] %vm41_vm0, %v172_v33 }
  0xe7   :  { %246 = vst.msk [vmem:[%s502_s3 + $0x58] sm:$0xff] %vm41_vm0, %v212_v34  ;;  %237 = vst.msk [vmem:[%s502_s3 + $0x10] sm:$0xff] %vm41_vm0, %v167_v37  ;;  %v308_v39 = vpop.f32.mrb[4].mxu0 }
  0xe8   :  { %245 = vst.msk [vmem:[%s502_s3 + $0x50] sm:$0xff] %vm41_vm0, %v207_v38  ;;  %v320_v40 = vpop.f32.mrb[4].mxu1  ;;  %v182_v41 = vadd.f32 %v308_v39, %v255_v22  ;;  %v176_v43 = vpop.f32.mrb[5].mxu0 }
  0xe9   :  { %v222_v42 = vadd.f32 %v320_v40, %v255_v22  ;;  %v216_v44 = vpop.f32.mrb[5].mxu1  ;;  %v177_v45 = vadd.f32 %v255_v22, %v176_v43 }
  0xea   :  { %v217_v46 = vadd.f32 %v255_v22, %v216_v44  ;;  %240 = vst.msk [vmem:[%s502_s3 + $0x28] sm:$0xff] %vm41_vm0, %v182_v41 }
  0xeb   :  { %248 = vst.msk [vmem:[%s502_s3 + $0x68] sm:$0xff] %vm41_vm0, %v222_v42  ;;  %239 = vst.msk [vmem:[%s502_s3 + $0x20] sm:$0xff] %vm41_vm0, %v177_v45  ;;  %v311_v47 = vpop.f32.mrb[6].mxu0 }
  0xec   :  { %247 = vst.msk [vmem:[%s502_s3 + $0x60] sm:$0xff] %vm41_vm0, %v217_v46  ;;  %v323_v48 = vpop.f32.mrb[6].mxu1  ;;  %v192_v49 = vadd.f32 %v311_v47, %v255_v22  ;;  %v186_v51 = vpop.f32.mrb[7].mxu0 }
  0xed   :  { %v232_v50 = vadd.f32 %v323_v48, %v255_v22  ;;  %v226_v52 = vpop.f32.mrb[7].mxu1  ;;  %v187_v53 = vadd.f32 %v255_v22, %v186_v51 }
  0xee   :  { %v227_v54 = vadd.f32 %v255_v22, %v226_v52  ;;  %242 = vst.msk [vmem:[%s502_s3 + $0x38] sm:$0xff] %vm41_vm0, %v192_v49 }
  0xef   :  { %250 = vst.msk [vmem:[%s502_s3 + $0x78] sm:$0xff] %vm41_vm0, %v232_v50  ;;  %241 = vst.msk [vmem:[%s502_s3 + $0x30] sm:$0xff] %vm41_vm0, %v187_v53 }
  0xf0   :  { %249 = vst.msk [vmem:[%s502_s3 + $0x70] sm:$0xff] %vm41_vm0, %v227_v54 }

</bundles_post_ra>
